<compile_context>
chip_gen: v6e
topology: v6e:2x2x1
jax: 0.10.0
libtpu: 0.0.40
codegen_flags: <defaults>
</compile_context>

<pallas_src>
import jax
import jax.numpy as jnp
from jax.experimental import pallas as pl
from jax.experimental.pallas import tpu as pltpu

DATA_DIMENSION = 32  # input_size of the GRU (undefined constant in the source)

_STATIC_UNROLL_MAX_T = 32


def gru_kernel(x_ref, w_ih_ref, w_hrz_ref, b3_ref, p_ref, out_ref, gate_ref):
    """Whole-sequence GRU recurrence in one invocation.

    x_ref    : (T, B, D) VMEM  — input sequence, TIME-MAJOR
    w_ih_ref : (3, D)    VMEM  — input->hidden weights, rows ordered [r, z, n]
    w_hrz_ref: (2, 1)    VMEM  — [[w_hr], [w_hz]]
    b3_ref   : (3, 1)    VMEM  — [[b_ir+b_hr], [b_iz+b_hz], [b_in]]
    p_ref    : (2,)      SMEM  — [w_hn, b_hn]
    out_ref  : (1, B)    VMEM  — final hidden state, lane-dense (B on lanes)
    gate_ref : (T, 3, B) VMEM scratch — per-step gate pre-activations
    """
    T, B, D = x_ref.shape

    x = x_ref[...]                               # (T, B, D)  f32
    w_ih = w_ih_ref[...]                         # (3, D)

    # Fused input->hidden projection for all gates & all timesteps:
    # one VPU multiply sweep + one XLU lane reduce -> (T, 3, B), B on lanes.
    gates = jnp.sum(x[:, None, :, :] * w_ih[None, :, None, :], axis=-1)
    # Fold the constant biases once for all steps and land in VMEM scratch so
    # the serial loop does lane-dense row loads (vld slot) instead of vreg
    # sublane extraction.
    gate_ref[...] = gates + b3_ref[...][None, :, :]

    w_hrz = w_hrz_ref[...]                       # (2, 1) — broadcasts against h
    w_hn = p_ref[0]                              # SMEM scalars (free broadcast)
    b_hn = p_ref[1]

    def step(t, h):
        g = gate_ref[t]                                   # (3, B) VMEM row load
        # Fused r/z sigmoid: one EUP push for both gates.
        rz = jax.nn.sigmoid(g[0:2, :] + w_hrz * h)        # (2, B)
        r = rz[0:1, :]
        z = rz[1:2, :]
        n = jnp.tanh(g[2:3, :] + r * (w_hn * h + b_hn))   # dependent tanh
        return (1.0 - z) * n + z * h

    h = jnp.zeros((1, B), jnp.float32)
    if T <= _STATIC_UNROLL_MAX_T:
        # Small T: full static unroll (best LLO scheduling, no loop overhead).
        for t in range(T):
            h = step(t, h)
    else:
        # Large T: partially-unrolled fori_loop over the VMEM-resident gates.
        h = jax.lax.fori_loop(0, T, step, h, unroll=8)

    out_ref[...] = h


def gru_last_output(x, w_ih, w_hh, b_ih, b_hh):
    """Equivalent of Model01.forward: returns y[:, -1, 0] with shape (B,).

    x    : (B, T, D)  float
    w_ih : (3, D)     PyTorch weight_ih_l0
    w_hh : (3, 1)     PyTorch weight_hh_l0
    b_ih : (3,)       PyTorch bias_ih_l0
    b_hh : (3,)       PyTorch bias_hh_l0
    """
    B, T, D = x.shape
    # Time-major input: one wrapper-side transpose (tiny, handled by XLA) so
    # the in-kernel projection is directly lane-dense in B — no XLU transposes.
    x_tm = jnp.transpose(x.astype(jnp.float32), (1, 0, 2))     # (T, B, D)
    w_ih = w_ih.astype(jnp.float32)
    w_hh = jnp.asarray(w_hh, jnp.float32).reshape(3)
    b_ih = jnp.asarray(b_ih, jnp.float32).reshape(3)
    b_hh = jnp.asarray(b_hh, jnp.float32).reshape(3)

    w_hrz = w_hh[0:2].reshape(2, 1)                            # [[w_hr],[w_hz]]
    b3 = jnp.stack([b_ih[0] + b_hh[0],                         # folded r bias
                    b_ih[1] + b_hh[1],                         # folded z bias
                    b_ih[2]]).reshape(3, 1)                    # b_in
    p = jnp.stack([w_hh[2], b_hh[2]])                          # [w_hn, b_hn]

    out = pl.pallas_call(
        gru_kernel,
        out_shape=jax.ShapeDtypeStruct((1, B), jnp.float32),
        in_specs=[
            pl.BlockSpec(memory_space=pltpu.MemorySpace.VMEM),   # x (time-major)
            pl.BlockSpec(memory_space=pltpu.MemorySpace.VMEM),   # w_ih
            pl.BlockSpec(memory_space=pltpu.MemorySpace.VMEM),   # w_hrz
            pl.BlockSpec(memory_space=pltpu.MemorySpace.VMEM),   # folded biases
            pl.BlockSpec(memory_space=pltpu.MemorySpace.SMEM),   # [w_hn, b_hn]
        ],
        out_specs=pl.BlockSpec(memory_space=pltpu.MemorySpace.VMEM),
        scratch_shapes=[pltpu.VMEM((T, 3, B), jnp.float32)],     # gate pre-acts
    )(x_tm, w_ih, w_hrz, b3, p)

    return out[0]   # (B,)


def gru_last_output_ref(x, w_ih, w_hh, b_ih, b_hh):
    """Pure-JAX reference (PyTorch GRU equations, gate order [r, z, n])."""
    B, T, D = x.shape
    x = x.astype(jnp.float32)

    def step(h, x_t):
        gi = x_t @ w_ih.T + b_ih         # (B, 3)
        gh = h @ w_hh.T + b_hh           # (B, 3)
        r = jax.nn.sigmoid(gi[:, 0:1] + gh[:, 0:1])
        z = jax.nn.sigmoid(gi[:, 1:2] + gh[:, 1:2])
        n = jnp.tanh(gi[:, 2:3] + r * gh[:, 2:3])
        return (1.0 - z) * n + z * h, None

    h0 = jnp.zeros((B, 1), jnp.float32)
    hT, _ = jax.lax.scan(step, h0, jnp.transpose(x, (1, 0, 2)))
    return hT[:, 0]


if __name__ == "__main__":
    B, T, D = 4, 8, DATA_DIMENSION

    key = jax.random.PRNGKey(0)
    kx, k1, k2, k3, k4 = jax.random.split(key, 5)

    # PyTorch GRU init: U(-1/sqrt(hidden), 1/sqrt(hidden)) = U(-1, 1) for hidden=1.
    x = jax.random.normal(kx, (B, T, D), dtype=jnp.float32)
    w_ih = jax.random.uniform(k1, (3, D), jnp.float32, minval=-1.0, maxval=1.0)
    w_hh = jax.random.uniform(k2, (3, 1), jnp.float32, minval=-1.0, maxval=1.0)
    b_ih = jax.random.uniform(k3, (3,), jnp.float32, minval=-1.0, maxval=1.0)
    b_hh = jax.random.uniform(k4, (3,), jnp.float32, minval=-1.0, maxval=1.0)

    y = gru_last_output(x, w_ih, w_hh, b_ih, b_hh)
    y = jax.block_until_ready(y)

    y_ref = gru_last_output_ref(x, w_ih, w_hh, b_ih, b_hh)
    assert y.shape == (B,)
    assert jnp.allclose(y, y_ref, atol=1e-5, rtol=1e-5), (y, y_ref)

    print("KERNEL_OK")
</pallas_src>

<mosaic_0001>
module attributes {stable_mosaic.version = 11 : i64} {
  func.func @gru_kernel(%arg0: memref<8x4x32xf32, #tpu.memory_space<vmem>>, %arg1: memref<3x32xf32, #tpu.memory_space<vmem>>, %arg2: memref<2x1xf32, #tpu.memory_space<vmem>>, %arg3: memref<3x1xf32, #tpu.memory_space<vmem>>, %arg4: memref<2xf32, #tpu.memory_space<smem>>, %arg5: memref<1x4xf32, #tpu.memory_space<vmem>>, %arg6: memref<8x3x4xf32, #tpu.memory_space<vmem>>) attributes {dimension_semantics = [], scalar_prefetch = 0 : i64, scratch_operands = 1 : i64, tpu.core_type = #tpu.core_type<tc>} {
    %c0 = arith.constant 0 : index
    %c0_0 = arith.constant 0 : index
    %c0_1 = arith.constant 0 : index
    %0 = vector.load %arg0[%c0, %c0_0, %c0_1] : memref<8x4x32xf32, #tpu.memory_space<vmem>>, vector<8x4x32xf32>
    %c0_2 = arith.constant 0 : index
    %c0_3 = arith.constant 0 : index
    %1 = vector.load %arg1[%c0_2, %c0_3] : memref<3x32xf32, #tpu.memory_space<vmem>>, vector<3x32xf32>
    %2 = vector.shape_cast %0 : vector<8x4x32xf32> to vector<8x1x4x32xf32>
    %3 = vector.shape_cast %1 : vector<3x32xf32> to vector<1x3x1x32xf32>
    %4 = vector.broadcast %2 : vector<8x1x4x32xf32> to vector<8x3x4x32xf32>
    %5 = vector.broadcast %3 : vector<1x3x1x32xf32> to vector<8x3x4x32xf32>
    %6 = arith.mulf %4, %5 : vector<8x3x4x32xf32>
    %cst = arith.constant dense<0.000000e+00> : vector<8x3x4xf32>
    %7 = vector.multi_reduction <add>, %6, %cst [3] : vector<8x3x4x32xf32> to vector<8x3x4xf32>
    %c0_4 = arith.constant 0 : index
    %c0_5 = arith.constant 0 : index
    %8 = vector.load %arg3[%c0_4, %c0_5] : memref<3x1xf32, #tpu.memory_space<vmem>>, vector<3x1xf32>
    %9 = vector.shape_cast %8 : vector<3x1xf32> to vector<1x3x1xf32>
    %10 = vector.broadcast %9 : vector<1x3x1xf32> to vector<8x3x4xf32>
    %11 = arith.addf %7, %10 : vector<8x3x4xf32>
    %c0_6 = arith.constant 0 : index
    %c0_7 = arith.constant 0 : index
    %c0_8 = arith.constant 0 : index
    %12 = vector.load %arg6[%c0_6, %c0_7, %c0_8] : memref<8x3x4xf32, #tpu.memory_space<vmem>>, vector<8x3x4xf32>
    tpu.vector_store %arg6[%c0_6, %c0_7, %c0_8], %11 {strides = array<i32>} : memref<8x3x4xf32, #tpu.memory_space<vmem>>, vector<8x3x4xf32>,
    %c0_9 = arith.constant 0 : index
    %c0_10 = arith.constant 0 : index
    %13 = vector.load %arg2[%c0_9, %c0_10] : memref<2x1xf32, #tpu.memory_space<vmem>>, vector<2x1xf32>
    %c0_11 = arith.constant 0 : index
    %14 = memref.load %arg4[%c0_11] : memref<2xf32, #tpu.memory_space<smem>>
    %c1 = arith.constant 1 : index
    %15 = memref.load %arg4[%c1] : memref<2xf32, #tpu.memory_space<smem>>
    %cst_12 = arith.constant 0.000000e+00 : f32
    %16 = vector.broadcast %cst_12 : f32 to vector<1x4xf32>
    %c0_13 = arith.constant 0 : index
    %c0_14 = arith.constant 0 : index
    %c0_15 = arith.constant 0 : index
    %17 = vector.load %arg6[%c0_13, %c0_14, %c0_15] : memref<8x3x4xf32, #tpu.memory_space<vmem>>, vector<1x3x4xf32>
    %18 = vector.shape_cast %17 : vector<1x3x4xf32> to vector<3x4xf32>
    %19 = vector.extract_strided_slice %18 {offsets = [0, 0], sizes = [2, 4], strides = [1, 1]} : vector<3x4xf32> to vector<2x4xf32>
    %20 = vector.broadcast %13 : vector<2x1xf32> to vector<2x4xf32>
    %21 = vector.broadcast %16 : vector<1x4xf32> to vector<2x4xf32>
    %22 = arith.mulf %20, %21 : vector<2x4xf32>
    %23 = arith.addf %19, %22 : vector<2x4xf32>
    %24 = arith.negf %23 : vector<2x4xf32>
    %25 = math.exp %24 : vector<2x4xf32>
    %cst_16 = arith.constant 1.000000e+00 : f32
    %26 = vector.broadcast %cst_16 : f32 to vector<2x4xf32>
    %27 = arith.addf %26, %25 : vector<2x4xf32>
    %28 = arith.divf %26, %27 : vector<2x4xf32>
    %29 = vector.extract_strided_slice %28 {offsets = [0, 0], sizes = [1, 4], strides = [1, 1]} : vector<2x4xf32> to vector<1x4xf32>
    %30 = vector.extract_strided_slice %28 {offsets = [1, 0], sizes = [1, 4], strides = [1, 1]} : vector<2x4xf32> to vector<1x4xf32>
    %31 = vector.extract_strided_slice %18 {offsets = [2, 0], sizes = [1, 4], strides = [1, 1]} : vector<3x4xf32> to vector<1x4xf32>
    %32 = vector.broadcast %14 : f32 to vector<1x4xf32>
    %33 = arith.mulf %32, %16 : vector<1x4xf32>
    %34 = vector.broadcast %15 : f32 to vector<1x4xf32>
    %35 = arith.addf %33, %34 : vector<1x4xf32>
    %36 = arith.mulf %29, %35 : vector<1x4xf32>
    %37 = arith.addf %31, %36 : vector<1x4xf32>
    %38 = math.tanh %37 : vector<1x4xf32>
    %cst_17 = arith.constant 1.000000e+00 : f32
    %39 = vector.broadcast %cst_17 : f32 to vector<1x4xf32>
    %40 = arith.subf %39, %30 : vector<1x4xf32>
    %41 = arith.mulf %40, %38 : vector<1x4xf32>
    %42 = arith.mulf %30, %16 : vector<1x4xf32>
    %43 = arith.addf %41, %42 : vector<1x4xf32>
    %c1_18 = arith.constant 1 : index
    %c0_19 = arith.constant 0 : index
    %c0_20 = arith.constant 0 : index
    %44 = vector.load %arg6[%c1_18, %c0_19, %c0_20] : memref<8x3x4xf32, #tpu.memory_space<vmem>>, vector<1x3x4xf32>
    %45 = vector.shape_cast %44 : vector<1x3x4xf32> to vector<3x4xf32>
    %46 = vector.extract_strided_slice %45 {offsets = [0, 0], sizes = [2, 4], strides = [1, 1]} : vector<3x4xf32> to vector<2x4xf32>
    %47 = vector.broadcast %13 : vector<2x1xf32> to vector<2x4xf32>
    %48 = vector.broadcast %43 : vector<1x4xf32> to vector<2x4xf32>
    %49 = arith.mulf %47, %48 : vector<2x4xf32>
    %50 = arith.addf %46, %49 : vector<2x4xf32>
    %51 = arith.negf %50 : vector<2x4xf32>
    %52 = math.exp %51 : vector<2x4xf32>
    %cst_21 = arith.constant 1.000000e+00 : f32
    %53 = vector.broadcast %cst_21 : f32 to vector<2x4xf32>
    %54 = arith.addf %53, %52 : vector<2x4xf32>
    %55 = arith.divf %53, %54 : vector<2x4xf32>
    %56 = vector.extract_strided_slice %55 {offsets = [0, 0], sizes = [1, 4], strides = [1, 1]} : vector<2x4xf32> to vector<1x4xf32>
    %57 = vector.extract_strided_slice %55 {offsets = [1, 0], sizes = [1, 4], strides = [1, 1]} : vector<2x4xf32> to vector<1x4xf32>
    %58 = vector.extract_strided_slice %45 {offsets = [2, 0], sizes = [1, 4], strides = [1, 1]} : vector<3x4xf32> to vector<1x4xf32>
    %59 = vector.broadcast %14 : f32 to vector<1x4xf32>
    %60 = arith.mulf %59, %43 : vector<1x4xf32>
    %61 = vector.broadcast %15 : f32 to vector<1x4xf32>
    %62 = arith.addf %60, %61 : vector<1x4xf32>
    %63 = arith.mulf %56, %62 : vector<1x4xf32>
    %64 = arith.addf %58, %63 : vector<1x4xf32>
    %65 = math.tanh %64 : vector<1x4xf32>
    %cst_22 = arith.constant 1.000000e+00 : f32
    %66 = vector.broadcast %cst_22 : f32 to vector<1x4xf32>
    %67 = arith.subf %66, %57 : vector<1x4xf32>
    %68 = arith.mulf %67, %65 : vector<1x4xf32>
    %69 = arith.mulf %57, %43 : vector<1x4xf32>
    %70 = arith.addf %68, %69 : vector<1x4xf32>
    %c2 = arith.constant 2 : index
    %c0_23 = arith.constant 0 : index
    %c0_24 = arith.constant 0 : index
    %71 = vector.load %arg6[%c2, %c0_23, %c0_24] : memref<8x3x4xf32, #tpu.memory_space<vmem>>, vector<1x3x4xf32>
    %72 = vector.shape_cast %71 : vector<1x3x4xf32> to vector<3x4xf32>
    %73 = vector.extract_strided_slice %72 {offsets = [0, 0], sizes = [2, 4], strides = [1, 1]} : vector<3x4xf32> to vector<2x4xf32>
    %74 = vector.broadcast %13 : vector<2x1xf32> to vector<2x4xf32>
    %75 = vector.broadcast %70 : vector<1x4xf32> to vector<2x4xf32>
    %76 = arith.mulf %74, %75 : vector<2x4xf32>
    %77 = arith.addf %73, %76 : vector<2x4xf32>
    %78 = arith.negf %77 : vector<2x4xf32>
    %79 = math.exp %78 : vector<2x4xf32>
    %cst_25 = arith.constant 1.000000e+00 : f32
    %80 = vector.broadcast %cst_25 : f32 to vector<2x4xf32>
    %81 = arith.addf %80, %79 : vector<2x4xf32>
    %82 = arith.divf %80, %81 : vector<2x4xf32>
    %83 = vector.extract_strided_slice %82 {offsets = [0, 0], sizes = [1, 4], strides = [1, 1]} : vector<2x4xf32> to vector<1x4xf32>
    %84 = vector.extract_strided_slice %82 {offsets = [1, 0], sizes = [1, 4], strides = [1, 1]} : vector<2x4xf32> to vector<1x4xf32>
    %85 = vector.extract_strided_slice %72 {offsets = [2, 0], sizes = [1, 4], strides = [1, 1]} : vector<3x4xf32> to vector<1x4xf32>
    %86 = vector.broadcast %14 : f32 to vector<1x4xf32>
    %87 = arith.mulf %86, %70 : vector<1x4xf32>
    %88 = vector.broadcast %15 : f32 to vector<1x4xf32>
    %89 = arith.addf %87, %88 : vector<1x4xf32>
    %90 = arith.mulf %83, %89 : vector<1x4xf32>
    %91 = arith.addf %85, %90 : vector<1x4xf32>
    %92 = math.tanh %91 : vector<1x4xf32>
    %cst_26 = arith.constant 1.000000e+00 : f32
    %93 = vector.broadcast %cst_26 : f32 to vector<1x4xf32>
    %94 = arith.subf %93, %84 : vector<1x4xf32>
    %95 = arith.mulf %94, %92 : vector<1x4xf32>
    %96 = arith.mulf %84, %70 : vector<1x4xf32>
    %97 = arith.addf %95, %96 : vector<1x4xf32>
    %c3 = arith.constant 3 : index
    %c0_27 = arith.constant 0 : index
    %c0_28 = arith.constant 0 : index
    %98 = vector.load %arg6[%c3, %c0_27, %c0_28] : memref<8x3x4xf32, #tpu.memory_space<vmem>>, vector<1x3x4xf32>
    %99 = vector.shape_cast %98 : vector<1x3x4xf32> to vector<3x4xf32>
    %100 = vector.extract_strided_slice %99 {offsets = [0, 0], sizes = [2, 4], strides = [1, 1]} : vector<3x4xf32> to vector<2x4xf32>
    %101 = vector.broadcast %13 : vector<2x1xf32> to vector<2x4xf32>
    %102 = vector.broadcast %97 : vector<1x4xf32> to vector<2x4xf32>
    %103 = arith.mulf %101, %102 : vector<2x4xf32>
    %104 = arith.addf %100, %103 : vector<2x4xf32>
    %105 = arith.negf %104 : vector<2x4xf32>
    %106 = math.exp %105 : vector<2x4xf32>
    %cst_29 = arith.constant 1.000000e+00 : f32
    %107 = vector.broadcast %cst_29 : f32 to vector<2x4xf32>
    %108 = arith.addf %107, %106 : vector<2x4xf32>
    %109 = arith.divf %107, %108 : vector<2x4xf32>
    %110 = vector.extract_strided_slice %109 {offsets = [0, 0], sizes = [1, 4], strides = [1, 1]} : vector<2x4xf32> to vector<1x4xf32>
    %111 = vector.extract_strided_slice %109 {offsets = [1, 0], sizes = [1, 4], strides = [1, 1]} : vector<2x4xf32> to vector<1x4xf32>
    %112 = vector.extract_strided_slice %99 {offsets = [2, 0], sizes = [1, 4], strides = [1, 1]} : vector<3x4xf32> to vector<1x4xf32>
    %113 = vector.broadcast %14 : f32 to vector<1x4xf32>
    %114 = arith.mulf %113, %97 : vector<1x4xf32>
    %115 = vector.broadcast %15 : f32 to vector<1x4xf32>
    %116 = arith.addf %114, %115 : vector<1x4xf32>
    %117 = arith.mulf %110, %116 : vector<1x4xf32>
    %118 = arith.addf %112, %117 : vector<1x4xf32>
    %119 = math.tanh %118 : vector<1x4xf32>
    %cst_30 = arith.constant 1.000000e+00 : f32
    %120 = vector.broadcast %cst_30 : f32 to vector<1x4xf32>
    %121 = arith.subf %120, %111 : vector<1x4xf32>
    %122 = arith.mulf %121, %119 : vector<1x4xf32>
    %123 = arith.mulf %111, %97 : vector<1x4xf32>
    %124 = arith.addf %122, %123 : vector<1x4xf32>
    %c4 = arith.constant 4 : index
    %c0_31 = arith.constant 0 : index
    %c0_32 = arith.constant 0 : index
    %125 = vector.load %arg6[%c4, %c0_31, %c0_32] : memref<8x3x4xf32, #tpu.memory_space<vmem>>, vector<1x3x4xf32>
    %126 = vector.shape_cast %125 : vector<1x3x4xf32> to vector<3x4xf32>
    %127 = vector.extract_strided_slice %126 {offsets = [0, 0], sizes = [2, 4], strides = [1, 1]} : vector<3x4xf32> to vector<2x4xf32>
    %128 = vector.broadcast %13 : vector<2x1xf32> to vector<2x4xf32>
    %129 = vector.broadcast %124 : vector<1x4xf32> to vector<2x4xf32>
    %130 = arith.mulf %128, %129 : vector<2x4xf32>
    %131 = arith.addf %127, %130 : vector<2x4xf32>
    %132 = arith.negf %131 : vector<2x4xf32>
    %133 = math.exp %132 : vector<2x4xf32>
    %cst_33 = arith.constant 1.000000e+00 : f32
    %134 = vector.broadcast %cst_33 : f32 to vector<2x4xf32>
    %135 = arith.addf %134, %133 : vector<2x4xf32>
    %136 = arith.divf %134, %135 : vector<2x4xf32>
    %137 = vector.extract_strided_slice %136 {offsets = [0, 0], sizes = [1, 4], strides = [1, 1]} : vector<2x4xf32> to vector<1x4xf32>
    %138 = vector.extract_strided_slice %136 {offsets = [1, 0], sizes = [1, 4], strides = [1, 1]} : vector<2x4xf32> to vector<1x4xf32>
    %139 = vector.extract_strided_slice %126 {offsets = [2, 0], sizes = [1, 4], strides = [1, 1]} : vector<3x4xf32> to vector<1x4xf32>
    %140 = vector.broadcast %14 : f32 to vector<1x4xf32>
    %141 = arith.mulf %140, %124 : vector<1x4xf32>
    %142 = vector.broadcast %15 : f32 to vector<1x4xf32>
    %143 = arith.addf %141, %142 : vector<1x4xf32>
    %144 = arith.mulf %137, %143 : vector<1x4xf32>
    %145 = arith.addf %139, %144 : vector<1x4xf32>
    %146 = math.tanh %145 : vector<1x4xf32>
    %cst_34 = arith.constant 1.000000e+00 : f32
    %147 = vector.broadcast %cst_34 : f32 to vector<1x4xf32>
    %148 = arith.subf %147, %138 : vector<1x4xf32>
    %149 = arith.mulf %148, %146 : vector<1x4xf32>
    %150 = arith.mulf %138, %124 : vector<1x4xf32>
    %151 = arith.addf %149, %150 : vector<1x4xf32>
    %c5 = arith.constant 5 : index
    %c0_35 = arith.constant 0 : index
    %c0_36 = arith.constant 0 : index
    %152 = vector.load %arg6[%c5, %c0_35, %c0_36] : memref<8x3x4xf32, #tpu.memory_space<vmem>>, vector<1x3x4xf32>
    %153 = vector.shape_cast %152 : vector<1x3x4xf32> to vector<3x4xf32>
    %154 = vector.extract_strided_slice %153 {offsets = [0, 0], sizes = [2, 4], strides = [1, 1]} : vector<3x4xf32> to vector<2x4xf32>
    %155 = vector.broadcast %13 : vector<2x1xf32> to vector<2x4xf32>
    %156 = vector.broadcast %151 : vector<1x4xf32> to vector<2x4xf32>
    %157 = arith.mulf %155, %156 : vector<2x4xf32>
    %158 = arith.addf %154, %157 : vector<2x4xf32>
    %159 = arith.negf %158 : vector<2x4xf32>
    %160 = math.exp %159 : vector<2x4xf32>
    %cst_37 = arith.constant 1.000000e+00 : f32
    %161 = vector.broadcast %cst_37 : f32 to vector<2x4xf32>
    %162 = arith.addf %161, %160 : vector<2x4xf32>
    %163 = arith.divf %161, %162 : vector<2x4xf32>
    %164 = vector.extract_strided_slice %163 {offsets = [0, 0], sizes = [1, 4], strides = [1, 1]} : vector<2x4xf32> to vector<1x4xf32>
    %165 = vector.extract_strided_slice %163 {offsets = [1, 0], sizes = [1, 4], strides = [1, 1]} : vector<2x4xf32> to vector<1x4xf32>
    %166 = vector.extract_strided_slice %153 {offsets = [2, 0], sizes = [1, 4], strides = [1, 1]} : vector<3x4xf32> to vector<1x4xf32>
    %167 = vector.broadcast %14 : f32 to vector<1x4xf32>
    %168 = arith.mulf %167, %151 : vector<1x4xf32>
    %169 = vector.broadcast %15 : f32 to vector<1x4xf32>
    %170 = arith.addf %168, %169 : vector<1x4xf32>
    %171 = arith.mulf %164, %170 : vector<1x4xf32>
    %172 = arith.addf %166, %171 : vector<1x4xf32>
    %173 = math.tanh %172 : vector<1x4xf32>
    %cst_38 = arith.constant 1.000000e+00 : f32
    %174 = vector.broadcast %cst_38 : f32 to vector<1x4xf32>
    %175 = arith.subf %174, %165 : vector<1x4xf32>
    %176 = arith.mulf %175, %173 : vector<1x4xf32>
    %177 = arith.mulf %165, %151 : vector<1x4xf32>
    %178 = arith.addf %176, %177 : vector<1x4xf32>
    %c6 = arith.constant 6 : index
    %c0_39 = arith.constant 0 : index
    %c0_40 = arith.constant 0 : index
    %179 = vector.load %arg6[%c6, %c0_39, %c0_40] : memref<8x3x4xf32, #tpu.memory_space<vmem>>, vector<1x3x4xf32>
    %180 = vector.shape_cast %179 : vector<1x3x4xf32> to vector<3x4xf32>
    %181 = vector.extract_strided_slice %180 {offsets = [0, 0], sizes = [2, 4], strides = [1, 1]} : vector<3x4xf32> to vector<2x4xf32>
    %182 = vector.broadcast %13 : vector<2x1xf32> to vector<2x4xf32>
    %183 = vector.broadcast %178 : vector<1x4xf32> to vector<2x4xf32>
    %184 = arith.mulf %182, %183 : vector<2x4xf32>
    %185 = arith.addf %181, %184 : vector<2x4xf32>
    %186 = arith.negf %185 : vector<2x4xf32>
    %187 = math.exp %186 : vector<2x4xf32>
    %cst_41 = arith.constant 1.000000e+00 : f32
    %188 = vector.broadcast %cst_41 : f32 to vector<2x4xf32>
    %189 = arith.addf %188, %187 : vector<2x4xf32>
    %190 = arith.divf %188, %189 : vector<2x4xf32>
    %191 = vector.extract_strided_slice %190 {offsets = [0, 0], sizes = [1, 4], strides = [1, 1]} : vector<2x4xf32> to vector<1x4xf32>
    %192 = vector.extract_strided_slice %190 {offsets = [1, 0], sizes = [1, 4], strides = [1, 1]} : vector<2x4xf32> to vector<1x4xf32>
    %193 = vector.extract_strided_slice %180 {offsets = [2, 0], sizes = [1, 4], strides = [1, 1]} : vector<3x4xf32> to vector<1x4xf32>
    %194 = vector.broadcast %14 : f32 to vector<1x4xf32>
    %195 = arith.mulf %194, %178 : vector<1x4xf32>
    %196 = vector.broadcast %15 : f32 to vector<1x4xf32>
    %197 = arith.addf %195, %196 : vector<1x4xf32>
    %198 = arith.mulf %191, %197 : vector<1x4xf32>
    %199 = arith.addf %193, %198 : vector<1x4xf32>
    %200 = math.tanh %199 : vector<1x4xf32>
    %cst_42 = arith.constant 1.000000e+00 : f32
    %201 = vector.broadcast %cst_42 : f32 to vector<1x4xf32>
    %202 = arith.subf %201, %192 : vector<1x4xf32>
    %203 = arith.mulf %202, %200 : vector<1x4xf32>
    %204 = arith.mulf %192, %178 : vector<1x4xf32>
    %205 = arith.addf %203, %204 : vector<1x4xf32>
    %c7 = arith.constant 7 : index
    %c0_43 = arith.constant 0 : index
    %c0_44 = arith.constant 0 : index
    %206 = vector.load %arg6[%c7, %c0_43, %c0_44] : memref<8x3x4xf32, #tpu.memory_space<vmem>>, vector<1x3x4xf32>
    %207 = vector.shape_cast %206 : vector<1x3x4xf32> to vector<3x4xf32>
    %208 = vector.extract_strided_slice %207 {offsets = [0, 0], sizes = [2, 4], strides = [1, 1]} : vector<3x4xf32> to vector<2x4xf32>
    %209 = vector.broadcast %13 : vector<2x1xf32> to vector<2x4xf32>
    %210 = vector.broadcast %205 : vector<1x4xf32> to vector<2x4xf32>
    %211 = arith.mulf %209, %210 : vector<2x4xf32>
    %212 = arith.addf %208, %211 : vector<2x4xf32>
    %213 = arith.negf %212 : vector<2x4xf32>
    %214 = math.exp %213 : vector<2x4xf32>
    %cst_45 = arith.constant 1.000000e+00 : f32
    %215 = vector.broadcast %cst_45 : f32 to vector<2x4xf32>
    %216 = arith.addf %215, %214 : vector<2x4xf32>
    %217 = arith.divf %215, %216 : vector<2x4xf32>
    %218 = vector.extract_strided_slice %217 {offsets = [0, 0], sizes = [1, 4], strides = [1, 1]} : vector<2x4xf32> to vector<1x4xf32>
    %219 = vector.extract_strided_slice %217 {offsets = [1, 0], sizes = [1, 4], strides = [1, 1]} : vector<2x4xf32> to vector<1x4xf32>
    %220 = vector.extract_strided_slice %207 {offsets = [2, 0], sizes = [1, 4], strides = [1, 1]} : vector<3x4xf32> to vector<1x4xf32>
    %221 = vector.broadcast %14 : f32 to vector<1x4xf32>
    %222 = arith.mulf %221, %205 : vector<1x4xf32>
    %223 = vector.broadcast %15 : f32 to vector<1x4xf32>
    %224 = arith.addf %222, %223 : vector<1x4xf32>
    %225 = arith.mulf %218, %224 : vector<1x4xf32>
    %226 = arith.addf %220, %225 : vector<1x4xf32>
    %227 = math.tanh %226 : vector<1x4xf32>
    %cst_46 = arith.constant 1.000000e+00 : f32
    %228 = vector.broadcast %cst_46 : f32 to vector<1x4xf32>
    %229 = arith.subf %228, %219 : vector<1x4xf32>
    %230 = arith.mulf %229, %227 : vector<1x4xf32>
    %231 = arith.mulf %219, %205 : vector<1x4xf32>
    %232 = arith.addf %230, %231 : vector<1x4xf32>
    %c0_47 = arith.constant 0 : index
    %c0_48 = arith.constant 0 : index
    %233 = vector.load %arg5[%c0_47, %c0_48] : memref<1x4xf32, #tpu.memory_space<vmem>>, vector<1x4xf32>
    tpu.vector_store %arg5[%c0_47, %c0_48], %232 {strides = array<i32>} : memref<1x4xf32, #tpu.memory_space<vmem>>, vector<1x4xf32>,
    return
  }
}

</mosaic_0001>

<bundles_post_ra>
// kernel: tpu_custom_call.1
= control target key start
LH: loop header
LB: loop body
LE: loop exit
PB: predicated region body
PF: predicated region fallthrough
CT: control target
= control target key end

     0   :  { %10 = vsyncpa [#allocation4], 0  ;;  %s1106_s0 = inlined_call_operand.hbm [shape: f32[8,4,32], index: 0, kind: input, shape index: {}]   ;;  %s1107_s1 = inlined_call_operand.vmem [shape: f32[3,32], index: 1, kind: input, shape index: {}]   ;;  %s1108_s2 = inlined_call_operand.vmem [shape: f32[2,1], index: 2, kind: input, shape index: {}]   ;;  %s1109_s3 = inlined_call_operand.vmem [shape: f32[3,1], index: 3, kind: input, shape index: {}]   ;;  %s1110_s4 = inlined_call_operand.vmem [shape: f32[2], index: 4, kind: input, shape index: {}]   ;;  %s1111_s5 = inlined_call_operand.hbm [shape: f32[1,4], index: 5, kind: output, shape index: {}]  }
   0x1   :  { %11 = vsyncpa [#allocation6], 0 }
   0x2   :  { %12 = vsyncpa [#allocation5], 0  ;;  %s867_s18 = smov [#allocation3]   ;;  %s37_s22 = sshll.u32 %s1110_s4, 4  ;;  %s38_s22 = int_to_ptr.vmem [resolvable:$true] %s37_s22 }
   0x3   :  { %s18_s19 = sshll.u32 %s867_s18, 4  ;;  %s19_s19 = int_to_ptr.vmem [resolvable:$true] %s18_s19 }
   0x4   :  { %s817_s23 = scalar_lea.vmem %s19_s19, 512  ;;  %p822_p1 = scmp.lt.s32.totalorder %s19_s19, %s19_s19 }
   0x5   :  { %p818_p0 = scmp.ne.s32.totalorder %s19_s19, %s817_s23  ;;  %p823_p2 = scmp.lt.s32.totalorder %s817_s23, %s817_s23 }
   0x7   :  { %p824_p3 = por %p823_p2, %p822_p1 }
   0x9   :  { %p825_p4 = pnand %p824_p3, %p818_p0 }
   0xb   :  { %828 = shalt.err (!%p825_p4)
}
   0xc   :  { %s868_s24 = smov 64   ;;  %s869_s25 = smov 4  }
   0xd   :  { %24 = dma.hbm_to_vmem [thread:$0]  %s1106_s0, 512, %s19_s19, [#allocation4], %s868_s24, %s868_s24, %s869_s25  }
   0xe   :  { %s829_s28 = scalar_lea.vmem %s38_s22, 16  ;;  %p834_p6 = scmp.lt.s32.totalorder %s38_s22, %s38_s22 }
   0xf   :  { %p830_p5 = scmp.ne.s32.totalorder %s38_s22, %s829_s28  ;;  %p835_p7 = scmp.lt.s32.totalorder %s829_s28, %s829_s28 }
  0x11   :  { %p836_p8 = por %p835_p7, %p834_p6 }
  0x13   :  { %p837_p9 = pnand %p836_p8, %p830_p5 }
  0x15   :  { %840 = shalt.err (!%p837_p9)
}
  0x16   :  { %s870_s4 = smov [#allocation7]  }
  0x17   :  { %40 = dma.vmem_to_smem %s38_s22, 16, %s870_s4, [#allocation6]  }
  0x18   :  { %861 = dma.done.wait [#allocation4], 512  }
  0x19   :  { %862 = vsyncadd [#allocation4], 4294966784 }
  0x1a   :  { %863 = dma.done.wait [#allocation6], 16  }
  0x1b   :  { %864 = vsyncadd [#allocation6], 4294967280 }
  0x1c   :  { %47 = sfence }
  0x1d   :  { %v69_v0 = vlaneseq  ;;  %v871_v1 = vmov 1966171168   ;;  %v872_v5 = vmov 0   ;;  %v48_v14 = vld [vmem:[#allocation3] sm:$0xf]  ;;  %vm120_vm0 = vcmask 257024  }
  0x1e   :  { %v67_v2 = vunpack.c.l.s4 %v871_v1  ;;  %759 = vset.pattern.permute.xlu1 %v872_v5  ;;  %760 = vset.pattern.permute.xlu0 %v872_v5  ;;  %v742_v6 = vld.sshfl [vmem:[%s1107_s1] sm:$0x13 pattern:$0x75316420]  ;;  %v49_v21 = vld [vmem:[#allocation3 + $0x4] sm:$0xf] }
  0x1f   :  { %v70_v3 = vshrl.u32 %v69_v0, 7  ;;  %v334_v4 = vand.u32 127, %v69_v0  ;;  %v65_v7 = vcombine.high %v742_v6, %v742_v6  ;;  %v193_v32 = vld [vmem:[%s1109_s3] sm:$0x7]  ;;  %v50_v46 = vld [vmem:[#allocation3 + $0x8] sm:$0xf] }
  0x20   :  { %v68_v8 = vunpack.c.0.s8 %v67_v2  ;;  %v466_v33 = vld [vmem:[%s1108_s2] sm:$0x3]  ;;  %v51_v48 = vld [vmem:[#allocation3 + $0xc] sm:$0xf]  ;;  %v965_v1 = vld [vmem:[#allocation3 + $0x10] sm:$0xf] }
  0x21   :  { %v913_v9 = vsub.s32 %v334_v4, %v70_v3  ;;  %v83_v11 = vsub.s32 0, %v70_v3  ;;  %v939_v36 = vsub.s32 1, %v70_v3  ;;  %v208_v37 = vsub.s32 2, %v70_v3  ;;  %s467_s2 = sld [smem:[#allocation7]]  ;;  %s873_s8 = smov [#allocation8]  }
  0x22   :  { %v71_v10 = vsub.s32 %v68_v8, %v70_v3  ;;  %vm431_vm1 = vcmask 1041409   ;;  %vm433_vm2 = vcmask 1042434   ;;  %vm457_vm3 = vcmask 26624   ;;  %s743_s3 = sld [smem:[#allocation7 + $0x1]]  ;;  %s732_s9 = sshll.u32 %s873_s8, 4  ;;  %s733_s9 = int_to_ptr.vmem [resolvable:$true] %s732_s9 }
  0x23   :  { %vm724_vm4 = vcmask 25601   ;;  %s841_s10 = scalar_lea.vmem %s733_s9, 16  ;;  %s845_s11 = scalar_lea.vmem %s733_s9, 32 }
  0x24   :  { %v72_v12 = vrot.slane %v742_v6, %v71_v10  ;;  %v79_v13 = vrot.slane %v65_v7, %v71_v10  ;;  %p842_p10 = scmp.ne.s32.totalorder %s733_s9, %s841_s10  ;;  %p846_p11 = scmp.lt.s32.totalorder %s733_s9, %s733_s9 }
  0x25   :  { %p847_p12 = scmp.lt.s32.totalorder %s845_s11, %s841_s10 }
  0x26   :  { %v915_v15 = vrot.slane %v72_v12, %v83_v11  ;;  %v80_v16 = vcombine.high %v72_v12, %v72_v12  ;;  %v917_v17 = vrot.slane %v79_v13, %v83_v11 }
  0x27   :  { %p848_p13 = por %p847_p12, %p846_p11 }
  0x28   :  { %v96_v18 = vmul.f32 %v915_v15, %v48_v14  ;;  %v920_v19 = vrot.slane %v80_v16, %v83_v11  ;;  %v97_v20 = vmul.f32 %v917_v17, %v48_v14  ;;  %v99_v26 = vmul.f32 %v915_v15, %v49_v21 }
  0x29   :  { %v100_v28 = vmul.f32 %v917_v17, %v49_v21  ;;  %v103_v47 = vmul.f32 %v917_v17, %v50_v46  ;;  %v105_v50 = vmul.f32 %v915_v15, %v51_v48  ;;  %v102_v53 = vmul.f32 %v915_v15, %v50_v46  ;;  %p849_p0 = pnand %p848_p13, %p842_p10 }
  0x2a   :  { %v121_v22 = vsel %vm120_vm0, %v96_v18, 0.0  ;;  %v98_v23 = vmul.f32 %v920_v19, %v48_v14  ;;  %v124_v25 = vsel %vm120_vm0, %v97_v20, 0.0  ;;  %v130_v27 = vsel %vm120_vm0, %v99_v26, 0.0 }
  0x2b   :  { %122 = vadd.xlane.f32.xlu0 %v121_v22  ;;  %v133_v29 = vsel %vm120_vm0, %v100_v28, 0.0  ;;  %v101_v30 = vmul.f32 %v920_v19, %v49_v21  ;;  %v142_v49 = vsel %vm120_vm0, %v103_v47, 0.0  ;;  %v148_v51 = vsel %vm120_vm0, %v105_v50, 0.0 }
  0x2c   :  { %v127_v24 = vsel %vm120_vm0, %v98_v23, 0.0  ;;  %v107_v52 = vmul.f32 %v920_v19, %v51_v48  ;;  %v139_v55 = vsel %vm120_vm0, %v102_v53, 0.0  ;;  %v104_v56 = vmul.f32 %v920_v19, %v50_v46 }
  0x2d   :  { %128 = vadd.xlane.f32.xlu1 %v127_v24  ;;  %v136_v31 = vsel %vm120_vm0, %v101_v30, 0.0  ;;  %v106_v0 = vmul.f32 %v917_v17, %v51_v48  ;;  %v109_v3 = vmul.f32 %v917_v17, %v965_v1  ;;  %v110_v5 = vmul.f32 %v920_v19, %v965_v1 }
  0x2e   :  { %v154_v54 = vsel %vm120_vm0, %v107_v52, 0.0  ;;  %v145_v57 = vsel %vm120_vm0, %v104_v56, 0.0  ;;  %v53_v56 = vld [vmem:[#allocation3 + $0x14] sm:$0xf] }
  0x2f   :  { %125 = vadd.xlane.f32.xlu0 %v124_v25  ;;  %v151_v2 = vsel %vm120_vm0, %v106_v0, 0.0  ;;  %v160_v4 = vsel %vm120_vm0, %v109_v3, 0.0  ;;  %v163_v6 = vsel %vm120_vm0, %v110_v5, 0.0 }
  0x33   :  { %131 = vadd.xlane.f32.xlu0 %v130_v27 }
  0x37   :  { %134 = vadd.xlane.f32.xlu0 %v133_v29  ;;  %v984_v29 = vstv %s467_s2 }
  0x3b   :  { %137 = vadd.xlane.f32.xlu0 %v136_v31 }
  0x3e   :  { %196 = vperm.xlu1 %759, %v193_v32   ;;  %v484_v32 = vmul.f32 0.0, %v984_v29 }
  0x42   :  { %472 = vperm.xlu1 %759, %v466_v33   ;;  %v988_v33 = vstv %s743_s3 }
  0xb4   :  { %v123_v34 = vpop.xlane.xlu0 %122 }
  0xb6   :  { %v129_v35 = vpop.xlane.xlu1 %128 }
  0xb8   :  { %v126_v41 = vpop.xlane.xlu0 %125 }
  0xba   :  { %v197_v38 = vpop.permute.xlu1 %196 }
  0xbb   :  { %v941_v39 = vrot.slane %v197_v38, %v83_v11  ;;  %v944_v40 = vrot.slane %v197_v38, %v939_v36  ;;  %v946_v42 = vrot.slane %v197_v38, %v208_v37  ;;  %v486_v37 = vadd.f32 %v988_v33, %v484_v32 }
  0xbc   :  { %v132_v58 = vpop.xlane.xlu0 %131 }
  0xbd   :  { %v213_v43 = vadd.f32 %v941_v39, %v123_v34  ;;  %v214_v44 = vadd.f32 %v944_v40, %v126_v41  ;;  %v215_v45 = vadd.f32 %v946_v42, %v129_v35  ;;  %v216_v60 = vadd.f32 %v941_v39, %v132_v58 }
  0xbe   :  { %v974_v7 = vpop.permute.xlu1 %472 }
  0xbf   :  { %262 = vperm.xlu0 %760, %v213_v43   ;;  %265 = vperm.xlu1 %759, %v214_v44   ;;  %v475_v21 = vmul.f32 0.0, %v974_v7 }
  0xc0   :  { %v135_v59 = vpop.xlane.xlu0 %134 }
  0xc1   :  { %v217_v61 = vadd.f32 %v944_v40, %v135_v59  ;;  %v111_v59 = vmul.f32 %v915_v15, %v53_v56 }
  0xc3   :  { %268 = vperm.xlu1 %759, %v215_v45  }
  0xc4   :  { %v138_v62 = vpop.xlane.xlu0 %137 }
  0xc5   :  { %v218_v63 = vadd.f32 %v946_v42, %v138_v62  ;;  %v166_v62 = vsel %vm120_vm0, %v111_v59, 0.0 }
  0xde   :  { %143 = vadd.xlane.f32.xlu0 %v142_v49 }
  0xe2   :  { %149 = vadd.xlane.f32.xlu0 %v148_v51 }
  0xe6   :  { %155 = vadd.xlane.f32.xlu0 %v154_v54 }
  0xe7   :  { %140 = vadd.xlane.f32.xlu1 %v139_v55  ;;  %v108_v55 = vmul.f32 %v915_v15, %v965_v1 }
  0xe9   :  { %v157_v58 = vsel %vm120_vm0, %v108_v55, 0.0 }
  0xeb   :  { %146 = vadd.xlane.f32.xlu1 %v145_v57 }
  0xfc   :  { %271 = vperm.xlu1 %759, %v216_v60  }
 0x100   :  { %274 = vperm.xlu1 %759, %v217_v61  }
 0x104   :  { %277 = vperm.xlu1 %759, %v218_v63   ;;  %v113_v63 = vmul.f32 %v920_v19, %v53_v56 }
 0x106   :  { %v172_v3 = vsel %vm120_vm0, %v113_v63, 0.0 }
 0x128   :  { %152 = vadd.xlane.f32.xlu1 %v151_v2 }
 0x12c   :  { %161 = vadd.xlane.f32.xlu1 %v160_v4 }
 0x130   :  { %164 = vadd.xlane.f32.xlu1 %v163_v6 }
 0x13a   :  { %v266_v8 = vpop.permute.xlu1 %265  ;;  %v263_v10 = vpop.permute.xlu0 %262 }
 0x13b   :  { %v342_v11 = vrot.slane %v266_v8, %v913_v9  ;;  %v338_v12 = vrot.slane %v263_v10, %v913_v9 }
 0x13d   :  { %v432_v16 = vsel %vm431_vm1, %v342_v11, %v338_v12 }
 0x13e   :  { %v269_v13 = vpop.permute.xlu1 %268 }
 0x13f   :  { %v346_v14 = vrot.slane %v269_v13, %v913_v9 }
 0x141   :  { %v434_v18 = vsel %vm433_vm2, %v346_v14, %v432_v16 }
 0x142   :  { %458 = vst.msk [vmem:[#allocation2] sm:$0x7] %vm457_vm3, %v434_v18 }
 0x149   :  { %v469_v20 = vld [vmem:[#allocation2] sm:$0x7] }
 0x14a   :  { %v476_v22 = vadd.f32 %v475_v21, %v469_v20 }
 0x14c   :  { %v744_v23 = vmul.f32 -1.442695, %v476_v22 }
 0x14e   :  { %761 = vpow2.f32 %v744_v23 }
 0x15b   :  { %v762_v24 = vpop.eup %761 }
 0x15c   :  { %v480_v25 = vadd.f32 1.0, %v762_v24  ;;  %v112_v24 = vmul.f32 %v917_v17, %v53_v56 }
 0x15e   :  { %763 = vrcp.f32 %v480_v25  ;;  %v1013_v25 = vld [vmem:[#allocation3 + $0x18] sm:$0xf] }
 0x15f   :  { %v116_v32 = vmul.f32 %v920_v19, %v1013_v25 }
 0x167   :  { %v144_v26 = vpop.xlane.xlu0 %143 }
 0x168   :  { %v220_v35 = vadd.f32 %v944_v40, %v144_v26 }
 0x16b   :  { %v150_v27 = vpop.xlane.xlu0 %149  ;;  %v764_v38 = vpop.eup %763 }
 0x16c   :  { %v222_v28 = vadd.f32 %v941_v39, %v150_v27  ;;  %v487_v44 = vmul.f32 %v764_v38, %v486_v37  ;;  %v493_v60 = vsub.f32 1.0, %v764_v38  ;;  %v498_v0 = vmul.f32 0.0, %v764_v38 }
 0x16d   :  { %v169_v27 = vsel %vm120_vm0, %v112_v24, 0.0 }
 0x16e   :  { %289 = vperm.xlu1 %759, %v222_v28   ;;  %v489_v47 = vrot.slane %v487_v44, 6  ;;  %v115_v28 = vmul.f32 %v917_v17, %v1013_v25 }
 0x16f   :  { %v156_v12 = vpop.xlane.xlu0 %155 }
 0x170   :  { %v141_v30 = vpop.xlane.xlu1 %140  ;;  %v491_v52 = vadd.f32 %v489_v47, %v469_v20  ;;  %v224_v13 = vadd.f32 %v946_v42, %v156_v12 }
 0x171   :  { %v219_v31 = vadd.f32 %v941_v39, %v141_v30 }
 0x172   :  { %765 = vtanh.f32 %v491_v52 }
 0x173   :  { %280 = vperm.xlu0 %760, %v219_v31   ;;  %v178_v31 = vsel %vm120_vm0, %v115_v28, 0.0 }
 0x174   :  { %v147_v34 = vpop.xlane.xlu1 %146 }
 0x175   :  { %v221_v43 = vadd.f32 %v946_v42, %v147_v34  ;;  %v181_v34 = vsel %vm120_vm0, %v116_v32, 0.0 }
 0x177   :  { %283 = vperm.xlu0 %760, %v220_v35  }
 0x178   :  { %v272_v41 = vpop.permute.xlu1 %271 }
 0x179   :  { %v350_v48 = vrot.slane %v272_v41, %v913_v9 }
 0x17b   :  { %286 = vperm.xlu0 %760, %v221_v43  }
 0x17c   :  { %v275_v45 = vpop.permute.xlu1 %274 }
 0x17d   :  { %v354_v46 = vrot.slane %v275_v45, %v913_v9 }
 0x17f   :  { %v435_v51 = vsel %vm431_vm1, %v354_v46, %v350_v48  ;;  %v766_v54 = vpop.eup %765 }
 0x180   :  { %v278_v49 = vpop.permute.xlu1 %277  ;;  %v495_v57 = vrot.slane %v766_v54, 1 }
 0x181   :  { %v358_v50 = vrot.slane %v278_v49, %v913_v9 }
 0x182   :  { %v497_v61 = vmul.f32 %v495_v57, %v493_v60 }
 0x183   :  { %v436_v53 = vsel %vm433_vm2, %v358_v50, %v435_v51 }
 0x184   :  { %459 = vst.msk [vmem:[#allocation2 + $0x4] sm:$0x7] %vm457_vm3, %v436_v53  ;;  %v499_v2 = vadd.f32 %v498_v0, %v497_v61 }
 0x186   :  { %v505_v1 = vrot.slane %v499_v2, %v939_v36  ;;  %v514_v18 = vmul.f32 %v499_v2, %v984_v29 }
 0x188   :  { %v506_v5 = vmul.f32 %v505_v1, %v974_v7  ;;  %v515_v20 = vadd.f32 %v514_v18, %v988_v33 }
 0x18a   :  { %v517_v22 = vrot.slane %v515_v20, 1 }
 0x18b   :  { %v501_v4 = vld [vmem:[#allocation2 + $0x4] sm:$0x7] }
 0x18c   :  { %v507_v6 = vadd.f32 %v506_v5, %v501_v4 }
 0x18e   :  { %v745_v8 = vmul.f32 -1.442695, %v507_v6 }
 0x190   :  { %767 = vpow2.f32 %v745_v8 }
 0x19a   :  { %158 = vadd.xlane.f32.xlu0 %v157_v58 }
 0x19d   :  { %v768_v14 = vpop.eup %767 }
 0x19e   :  { %167 = vadd.xlane.f32.xlu0 %v166_v62  ;;  %v511_v16 = vadd.f32 1.0, %v768_v14 }
 0x1a0   :  { %769 = vrcp.f32 %v511_v16 }
 0x1a2   :  { %173 = vadd.xlane.f32.xlu0 %v172_v3 }
 0x1ad   :  { %v770_v21 = vpop.eup %769 }
 0x1ae   :  { %v519_v23 = vmul.f32 %v770_v21, %v517_v22  ;;  %v525_v43 = vsub.f32 1.0, %v770_v21  ;;  %v530_v48 = vmul.f32 %v770_v21, %v499_v2 }
 0x1b0   :  { %v521_v26 = vrot.slane %v519_v23, 6 }
 0x1b1   :  { %v153_v10 = vpop.xlane.xlu1 %152 }
 0x1b2   :  { %v223_v11 = vadd.f32 %v944_v40, %v153_v10  ;;  %v523_v30 = vadd.f32 %v521_v26, %v501_v4  ;;  %v114_v26 = vmul.f32 %v915_v15, %v1013_v25 }
 0x1b4   :  { %292 = vperm.xlu1 %759, %v223_v11   ;;  %771 = vtanh.f32 %v523_v30 }
 0x1b5   :  { %v162_v60 = vpop.xlane.xlu1 %161 }
 0x1b6   :  { %v226_v4 = vadd.f32 %v944_v40, %v162_v60 }
 0x1b8   :  { %295 = vperm.xlu1 %759, %v224_v13  }
 0x1b9   :  { %v165_v2 = vpop.xlane.xlu1 %164 }
 0x1ba   :  { %v227_v11 = vadd.f32 %v946_v42, %v165_v2 }
 0x1c1   :  { %v772_v35 = vpop.eup %771 }
 0x1c2   :  { %v527_v38 = vrot.slane %v772_v35, 1 }
 0x1c4   :  { %v529_v45 = vmul.f32 %v527_v38, %v525_v43 }
 0x1c6   :  { %v531_v51 = vadd.f32 %v530_v48, %v529_v45 }
 0x1c8   :  { %v537_v53 = vrot.slane %v531_v51, %v939_v36  ;;  %v546_v61 = vmul.f32 %v531_v51, %v984_v29 }
 0x1ca   :  { %v538_v54 = vmul.f32 %v537_v53, %v974_v7  ;;  %v547_v0 = vadd.f32 %v546_v61, %v988_v33 }
 0x1cc   :  { %v549_v6 = vrot.slane %v547_v0, 1 }
 0x1dc   :  { %170 = vadd.xlane.f32.xlu1 %v169_v27  ;;  %v55_v27 = vld [vmem:[#allocation3 + $0x1c] sm:$0xf] }
 0x1dd   :  { %v117_v32 = vmul.f32 %v915_v15, %v55_v27  ;;  %v119_v38 = vmul.f32 %v920_v19, %v55_v27 }
 0x1df   :  { %v190_v43 = vsel %vm120_vm0, %v119_v38, 0.0 }
 0x1e0   :  { %179 = vadd.xlane.f32.xlu1 %v178_v31  ;;  %v175_v31 = vsel %vm120_vm0, %v114_v26, 0.0 }
 0x1e4   :  { %182 = vadd.xlane.f32.xlu1 %v181_v34 }
 0x1e9   :  { %v290_v8 = vpop.permute.xlu1 %289 }
 0x1ea   :  { %v374_v16 = vrot.slane %v290_v8, %v913_v9 }
 0x1ee   :  { %v281_v37 = vpop.permute.xlu0 %280 }
 0x1ef   :  { %v362_v46 = vrot.slane %v281_v37, %v913_v9  ;;  %v184_v37 = vsel %vm120_vm0, %v117_v32, 0.0 }
 0x1f2   :  { %v284_v41 = vpop.permute.xlu0 %283 }
 0x1f3   :  { %v366_v44 = vrot.slane %v284_v41, %v913_v9 }
 0x1f5   :  { %v437_v50 = vsel %vm431_vm1, %v366_v44, %v362_v46 }
 0x1f6   :  { %v287_v47 = vpop.permute.xlu0 %286 }
 0x1f7   :  { %v370_v49 = vrot.slane %v287_v47, %v913_v9 }
 0x1f9   :  { %v438_v52 = vsel %vm433_vm2, %v370_v49, %v437_v50 }
 0x1fa   :  { %460 = vst.msk [vmem:[#allocation2 + $0x8] sm:$0x7] %vm457_vm3, %v438_v52 }
 0x201   :  { %v533_v55 = vld [vmem:[#allocation2 + $0x8] sm:$0x7] }
 0x202   :  { %v539_v56 = vadd.f32 %v538_v54, %v533_v55 }
 0x204   :  { %v746_v57 = vmul.f32 -1.442695, %v539_v56 }
 0x206   :  { %773 = vpow2.f32 %v746_v57  ;;  %v118_v57 = vmul.f32 %v917_v17, %v55_v27 }
 0x213   :  { %v774_v58 = vpop.eup %773 }
 0x214   :  { %v543_v59 = vadd.f32 1.0, %v774_v58 }
 0x216   :  { %775 = vrcp.f32 %v543_v59  ;;  %v187_v59 = vsel %vm120_vm0, %v118_v57, 0.0 }
 0x223   :  { %v159_v62 = vpop.xlane.xlu0 %158  ;;  %v776_v1 = vpop.eup %775 }
 0x224   :  { %v225_v63 = vadd.f32 %v941_v39, %v159_v62  ;;  %v551_v10 = vmul.f32 %v776_v1, %v549_v6  ;;  %v557_v30 = vsub.f32 1.0, %v776_v1  ;;  %v562_v35 = vmul.f32 %v776_v1, %v531_v51 }
 0x226   :  { %298 = vperm.xlu0 %760, %v225_v63   ;;  %v553_v13 = vrot.slane %v551_v10, 6 }
 0x227   :  { %v168_v3 = vpop.xlane.xlu0 %167 }
 0x228   :  { %v228_v5 = vadd.f32 %v941_v39, %v168_v3  ;;  %v555_v20 = vadd.f32 %v553_v13, %v533_v55 }
 0x22a   :  { %301 = vperm.xlu0 %760, %v226_v4   ;;  %307 = vperm.xlu1 %759, %v228_v5   ;;  %777 = vtanh.f32 %v555_v20 }
 0x22b   :  { %v174_v49 = vpop.xlane.xlu0 %173 }
 0x22c   :  { %v230_v19 = vadd.f32 %v946_v42, %v174_v49 }
 0x22e   :  { %304 = vperm.xlu0 %760, %v227_v11  }
 0x22f   :  { %v293_v12 = vpop.permute.xlu1 %292 }
 0x230   :  { %v378_v14 = vrot.slane %v293_v12, %v913_v9 }
 0x232   :  { %v439_v22 = vsel %vm431_vm1, %v378_v14, %v374_v16 }
 0x233   :  { %v296_v18 = vpop.permute.xlu1 %295 }
 0x234   :  { %v382_v21 = vrot.slane %v296_v18, %v913_v9 }
 0x236   :  { %v440_v23 = vsel %vm433_vm2, %v382_v21, %v439_v22 }
 0x237   :  { %461 = vst.msk [vmem:[#allocation2 + $0xc] sm:$0x7] %vm457_vm3, %v440_v23  ;;  %v778_v24 = vpop.eup %777 }
 0x238   :  { %v559_v28 = vrot.slane %v778_v24, 1 }
 0x23a   :  { %v561_v34 = vmul.f32 %v559_v28, %v557_v30 }
 0x23c   :  { %v563_v41 = vadd.f32 %v562_v35, %v561_v34 }
 0x23e   :  { %v569_v25 = vrot.slane %v563_v41, %v939_v36  ;;  %v565_v45 = vld [vmem:[#allocation2 + $0xc] sm:$0x7]  ;;  %v578_v52 = vmul.f32 %v563_v41, %v984_v29 }
 0x240   :  { %v570_v44 = vmul.f32 %v569_v25, %v974_v7  ;;  %v579_v53 = vadd.f32 %v578_v52, %v988_v33 }
 0x242   :  { %v571_v46 = vadd.f32 %v570_v44, %v565_v45  ;;  %v581_v55 = vrot.slane %v579_v53, 1 }
 0x244   :  { %v747_v47 = vmul.f32 -1.442695, %v571_v46 }
 0x246   :  { %779 = vpow2.f32 %v747_v47 }
 0x24d   :  { %176 = vadd.xlane.f32.xlu0 %v175_v31 }
 0x251   :  { %185 = vadd.xlane.f32.xlu0 %v184_v37 }
 0x253   :  { %v780_v50 = vpop.eup %779 }
 0x254   :  { %v575_v51 = vadd.f32 1.0, %v780_v50 }
 0x255   :  { %191 = vadd.xlane.f32.xlu0 %v190_v43 }
 0x256   :  { %781 = vrcp.f32 %v575_v51 }
 0x263   :  { %v782_v54 = vpop.eup %781 }
 0x264   :  { %v583_v56 = vmul.f32 %v782_v54, %v581_v55  ;;  %v589_v2 = vsub.f32 1.0, %v782_v54  ;;  %v594_v6 = vmul.f32 %v782_v54, %v563_v41 }
 0x265   :  { %v171_v15 = vpop.xlane.xlu1 %170 }
 0x266   :  { %v229_v48 = vadd.f32 %v944_v40, %v171_v15  ;;  %v585_v58 = vrot.slane %v583_v56, 6 }
 0x268   :  { %310 = vperm.xlu1 %759, %v229_v48   ;;  %v587_v60 = vadd.f32 %v585_v58, %v565_v45 }
 0x269   :  { %v180_v23 = vpop.xlane.xlu1 %179 }
 0x26a   :  { %783 = vtanh.f32 %v587_v60  ;;  %v232_v30 = vadd.f32 %v944_v40, %v180_v23 }
 0x26c   :  { %313 = vperm.xlu1 %759, %v230_v19  }
 0x26d   :  { %v183_v31 = vpop.xlane.xlu1 %182 }
 0x26e   :  { %v233_v37 = vadd.f32 %v946_v42, %v183_v31 }
 0x277   :  { %v784_v61 = vpop.eup %783 }
 0x278   :  { %v591_v63 = vrot.slane %v784_v61, 1 }
 0x27a   :  { %v593_v1 = vmul.f32 %v591_v63, %v589_v2 }
 0x27c   :  { %v595_v10 = vadd.f32 %v594_v6, %v593_v1 }
 0x27e   :  { %v601_v12 = vrot.slane %v595_v10, %v939_v36  ;;  %v610_v22 = vmul.f32 %v595_v10, %v984_v29 }
 0x280   :  { %v602_v13 = vmul.f32 %v601_v12, %v974_v7  ;;  %v611_v27 = vadd.f32 %v610_v22, %v988_v33 }
 0x282   :  { %v613_v32 = vrot.slane %v611_v27, 1 }
 0x290   :  { %188 = vadd.xlane.f32.xlu1 %v187_v59 }
 0x2a1   :  { %v299_v62 = vpop.permute.xlu0 %298 }
 0x2a2   :  { %v386_v4 = vrot.slane %v299_v62, %v913_v9 }
 0x2a5   :  { %v302_v0 = vpop.permute.xlu0 %301  ;;  %v308_v38 = vpop.permute.xlu1 %307 }
 0x2a6   :  { %v390_v3 = vrot.slane %v302_v0, %v913_v9  ;;  %v398_v47 = vrot.slane %v308_v38, %v913_v9 }
 0x2a8   :  { %v441_v8 = vsel %vm431_vm1, %v390_v3, %v386_v4 }
 0x2a9   :  { %v305_v5 = vpop.permute.xlu0 %304 }
 0x2aa   :  { %v394_v17 = vrot.slane %v305_v5, %v913_v9 }
 0x2ac   :  { %v442_v11 = vsel %vm433_vm2, %v394_v17, %v441_v8 }
 0x2ad   :  { %462 = vst.msk [vmem:[#allocation2 + $0x10] sm:$0x7] %vm457_vm3, %v442_v11 }
 0x2b4   :  { %v597_v14 = vld [vmem:[#allocation2 + $0x10] sm:$0x7] }
 0x2b5   :  { %v603_v16 = vadd.f32 %v602_v13, %v597_v14 }
 0x2b7   :  { %v748_v18 = vmul.f32 -1.442695, %v603_v16 }
 0x2b9   :  { %785 = vpow2.f32 %v748_v18 }
 0x2c6   :  { %v786_v20 = vpop.eup %785 }
 0x2c7   :  { %v607_v21 = vadd.f32 1.0, %v786_v20 }
 0x2c9   :  { %787 = vrcp.f32 %v607_v21 }
 0x2d6   :  { %v177_v24 = vpop.xlane.xlu0 %176  ;;  %v788_v28 = vpop.eup %787 }
 0x2d7   :  { %v231_v26 = vadd.f32 %v941_v39, %v177_v24  ;;  %v615_v35 = vmul.f32 %v788_v28, %v613_v32  ;;  %v621_v52 = vsub.f32 1.0, %v788_v28  ;;  %v626_v54 = vmul.f32 %v788_v28, %v595_v10 }
 0x2d9   :  { %316 = vperm.xlu0 %760, %v231_v26   ;;  %v617_v41 = vrot.slane %v615_v35, 6 }
 0x2da   :  { %v186_v34 = vpop.xlane.xlu0 %185 }
 0x2db   :  { %v234_v43 = vadd.f32 %v941_v39, %v186_v34  ;;  %v619_v46 = vadd.f32 %v617_v41, %v597_v14 }
 0x2dd   :  { %319 = vperm.xlu0 %760, %v232_v30   ;;  %789 = vtanh.f32 %v619_v46 }
 0x2de   :  { %v192_v44 = vpop.xlane.xlu0 %191 }
 0x2df   :  { %v236_v15 = vadd.f32 %v946_v42, %v192_v44 }
 0x2e1   :  { %322 = vperm.xlu0 %760, %v233_v37  }
 0x2e3   :  { %v311_v25 = vpop.permute.xlu1 %310 }
 0x2e4   :  { %v402_v45 = vrot.slane %v311_v25, %v913_v9 }
 0x2e5   :  { %325 = vperm.xlu0 %760, %v234_v43  }
 0x2e6   :  { %v443_v19 = vsel %vm431_vm1, %v402_v45, %v398_v47 }
 0x2e7   :  { %v314_v48 = vpop.permute.xlu1 %313 }
 0x2e8   :  { %v406_v49 = vrot.slane %v314_v48, %v913_v9 }
 0x2e9   :  { %331 = vperm.xlu0 %760, %v236_v15  }
 0x2ea   :  { %v444_v50 = vsel %vm433_vm2, %v406_v49, %v443_v19  ;;  %v790_v39 = vpop.eup %789 }
 0x2eb   :  { %463 = vst.msk [vmem:[#allocation2 + $0x14] sm:$0x7] %vm457_vm3, %v444_v50  ;;  %v623_v51 = vrot.slane %v790_v39, 1 }
 0x2ed   :  { %v625_v53 = vmul.f32 %v623_v51, %v621_v52 }
 0x2ef   :  { %v627_v55 = vadd.f32 %v626_v54, %v625_v53 }
 0x2f1   :  { %v633_v56 = vrot.slane %v627_v55, %v939_v36  ;;  %v642_v0 = vmul.f32 %v627_v55, %v984_v29 }
 0x2f2   :  { %v629_v57 = vld [vmem:[#allocation2 + $0x14] sm:$0x7] }
 0x2f3   :  { %v634_v42 = vmul.f32 %v633_v56, %v974_v7  ;;  %v643_v2 = vadd.f32 %v642_v0, %v988_v33 }
 0x2f5   :  { %v635_v58 = vadd.f32 %v634_v42, %v629_v57  ;;  %v645_v1 = vrot.slane %v643_v2, 1 }
 0x2f7   :  { %v749_v59 = vmul.f32 -1.442695, %v635_v58 }
 0x2f9   :  { %791 = vpow2.f32 %v749_v59 }
 0x306   :  { %v792_v62 = vpop.eup %791 }
 0x307   :  { %v639_v63 = vadd.f32 1.0, %v792_v62 }
 0x309   :  { %793 = vrcp.f32 %v639_v63 }
 0x316   :  { %v794_v3 = vpop.eup %793 }
 0x317   :  { %v647_v4 = vmul.f32 %v794_v3, %v645_v1  ;;  %v653_v12 = vsub.f32 1.0, %v794_v3  ;;  %v658_v18 = vmul.f32 %v794_v3, %v627_v55 }
 0x319   :  { %v189_v60 = vpop.xlane.xlu1 %188  ;;  %v649_v5 = vrot.slane %v647_v4, 6 }
 0x31a   :  { %v235_v61 = vadd.f32 %v944_v40, %v189_v60 }
 0x31b   :  { %v651_v6 = vadd.f32 %v649_v5, %v629_v57 }
 0x31c   :  { %328 = vperm.xlu1 %759, %v235_v61  }
 0x31d   :  { %795 = vtanh.f32 %v651_v6 }
 0x32a   :  { %v796_v17 = vpop.eup %795 }
 0x32b   :  { %v655_v10 = vrot.slane %v796_v17, 1 }
 0x32d   :  { %v657_v13 = vmul.f32 %v655_v10, %v653_v12 }
 0x32f   :  { %v659_v22 = vadd.f32 %v658_v18, %v657_v13 }
 0x331   :  { %v665_v24 = vrot.slane %v659_v22, %v939_v36  ;;  %v674_v34 = vmul.f32 %v659_v22, %v984_v29 }
 0x333   :  { %v666_v26 = vmul.f32 %v665_v24, %v974_v7  ;;  %v675_v35 = vadd.f32 %v674_v34, %v988_v33 }
 0x335   :  { %v677_v37 = vrot.slane %v675_v35, 1 }
 0x354   :  { %v317_v8 = vpop.permute.xlu0 %316 }
 0x355   :  { %v410_v14 = vrot.slane %v317_v8, %v913_v9 }
 0x358   :  { %v320_v11 = vpop.permute.xlu0 %319 }
 0x359   :  { %v414_v40 = vrot.slane %v320_v11, %v913_v9 }
 0x35b   :  { %v445_v21 = vsel %vm431_vm1, %v414_v40, %v410_v14 }
 0x35c   :  { %v323_v16 = vpop.permute.xlu0 %322 }
 0x35d   :  { %v418_v20 = vrot.slane %v323_v16, %v913_v9 }
 0x35f   :  { %v446_v23 = vsel %vm433_vm2, %v418_v20, %v445_v21 }
 0x360   :  { %464 = vst.msk [vmem:[#allocation2 + $0x18] sm:$0x7] %vm457_vm3, %v446_v23  ;;  %v326_v44 = vpop.permute.xlu0 %325 }
 0x361   :  { %v422_v47 = vrot.slane %v326_v44, %v913_v9 }
 0x364   :  { %v332_v45 = vpop.permute.xlu0 %331 }
 0x365   :  { %v430_v48 = vrot.slane %v332_v45, %v913_v9 }
 0x367   :  { %v661_v27 = vld [vmem:[#allocation2 + $0x18] sm:$0x7] }
 0x368   :  { %v667_v28 = vadd.f32 %v666_v26, %v661_v27 }
 0x36a   :  { %v750_v30 = vmul.f32 -1.442695, %v667_v28 }
 0x36c   :  { %797 = vpow2.f32 %v750_v30 }
 0x379   :  { %v798_v31 = vpop.eup %797 }
 0x37a   :  { %v671_v32 = vadd.f32 1.0, %v798_v31 }
 0x37c   :  { %799 = vrcp.f32 %v671_v32 }
 0x389   :  { %v800_v38 = vpop.eup %799 }
 0x38a   :  { %v679_v41 = vmul.f32 %v800_v38, %v677_v37  ;;  %v685_v39 = vsub.f32 1.0, %v800_v38  ;;  %v690_v53 = vmul.f32 %v800_v38, %v659_v22 }
 0x38c   :  { %v681_v43 = vrot.slane %v679_v41, 6 }
 0x38e   :  { %v683_v25 = vadd.f32 %v681_v43, %v661_v27 }
 0x390   :  { %801 = vtanh.f32 %v683_v25 }
 0x397   :  { %v329_v46 = vpop.permute.xlu1 %328 }
 0x398   :  { %v426_v15 = vrot.slane %v329_v46, %v913_v9 }
 0x39a   :  { %v447_v49 = vsel %vm431_vm1, %v426_v15, %v422_v47 }
 0x39b   :  { %v448_v19 = vsel %vm433_vm2, %v430_v48, %v447_v49 }
 0x39c   :  { %465 = vst.msk [vmem:[#allocation2 + $0x1c] sm:$0x7] %vm457_vm3, %v448_v19 }
 0x39d   :  { %v802_v50 = vpop.eup %801 }
 0x39e   :  { %v687_v51 = vrot.slane %v802_v50, 1 }
 0x3a0   :  { %v689_v52 = vmul.f32 %v687_v51, %v685_v39 }
 0x3a2   :  { %v691_v54 = vadd.f32 %v690_v53, %v689_v52 }
 0x3a3   :  { %v693_v42 = vld [vmem:[#allocation2 + $0x1c] sm:$0x7] }
 0x3a4   :  { %v697_v55 = vrot.slane %v691_v54, %v939_v36  ;;  %v706_v60 = vmul.f32 %v691_v54, %v984_v29 }
 0x3a6   :  { %v698_v56 = vmul.f32 %v697_v55, %v974_v7  ;;  %v707_v61 = vadd.f32 %v706_v60, %v988_v33 }
 0x3a8   :  { %v699_v57 = vadd.f32 %v698_v56, %v693_v42  ;;  %v709_v62 = vrot.slane %v707_v61, 1 }
 0x3aa   :  { %v751_v58 = vmul.f32 -1.442695, %v699_v57 }
 0x3ac   :  { %803 = vpow2.f32 %v751_v58 }
 0x3b9   :  { %v804_v9 = vpop.eup %803 }
 0x3ba   :  { %v703_v59 = vadd.f32 1.0, %v804_v9 }
 0x3bc   :  { %805 = vrcp.f32 %v703_v59 }
 0x3c9   :  { %v806_v63 = vpop.eup %805 }
 0x3ca   :  { %v711_v0 = vmul.f32 %v806_v63, %v709_v62  ;;  %v717_v1 = vsub.f32 1.0, %v806_v63  ;;  %v722_v5 = vmul.f32 %v806_v63, %v691_v54 }
 0x3cc   :  { %v713_v2 = vrot.slane %v711_v0, 6 }
 0x3ce   :  { %v715_v3 = vadd.f32 %v713_v2, %v693_v42 }
 0x3d0   :  { %807 = vtanh.f32 %v715_v3 }
 0x3dd   :  { %v808_v36 = vpop.eup %807 }
 0x3de   :  { %v719_v7 = vrot.slane %v808_v36, 1 }
 0x3e0   :  { %v721_v4 = vmul.f32 %v719_v7, %v717_v1 }
 0x3e2   :  { %v723_v6 = vadd.f32 %v722_v5, %v721_v4 }
 0x3e4   :  { %725 = vst.msk [vmem:[#allocation8 - $0x1] sm:$0x2] %vm724_vm4, %v723_v6 }
 0x3e5   :  { %852 = shalt.err (!%p849_p0)
}
 0x3e6   :  { %735 = dma.vmem_to_hbm [thread:$0]  %s733_s9, 16, %s1111_s5, [#allocation5]  }
 0x3e7   :  { %865 = dma.done.wait [#allocation5], 16  }
 0x3e8   :  { %866 = vsyncadd [#allocation5], 4294967280 }
 0x3e9   :  { %739 = vsyncpa [#allocation4], 1 }
 0x3ea   :  { %740 = vsyncpa [#allocation5], 1 }
 0x3eb   :  { %741 = vsyncpa [#allocation6], 1 }

</bundles_post_ra>
